<compile_context>
chip_gen: v6e
topology: v6e:2x2x1
jax: 0.10.0
libtpu: 0.0.40
codegen_flags: <defaults>
</compile_context>

<pallas_src>
import jax
import jax.numpy as jnp
from jax.experimental import pallas as pl
from jax.experimental.pallas import tpu as pltpu

_LANE = 128  # lanes per vreg


def _mlp_kernel(x_ref, w1_ref, b1_ref, w2_ref, b2_ref, w3_ref, b3_ref, o_ref):
    """One batch tile. Activations are (features, batch): batch on the lane axis."""
    x = x_ref[...]                                         # (bt, 4) natural layout

    # Layer 1 (4 -> 64) on the MXU: contract the size-4 feature axis of w1 and
    # x (rhs-transposed matmul); batch lands on lanes, no explicit transpose.
    h1 = jax.lax.dot_general(
        w1_ref[...], x,
        dimension_numbers=(((1,), (1,)), ((), ())),
        preferred_element_type=jnp.float32)                # (64, bt)
    h1 = jnp.maximum(h1 + b1_ref[...], 0.0)

    # Layer 2 (64 -> 64) on the MXU.
    h2 = jnp.dot(w2_ref[...], h1, preferred_element_type=jnp.float32)
    h2 = jnp.maximum(h2 + b2_ref[...], 0.0)                # (64, bt)

    # Layer 3 (64 -> 1) on the MXU: w3 zero-padded to (8, 64), row 0 is real.
    y = jnp.dot(w3_ref[...], h2, preferred_element_type=jnp.float32)   # (8, bt)
    o_ref[...] = (y[0:1, :] + b3_ref[...]).astype(o_ref.dtype)         # (1, bt)


def net_forward(x, params, *, b_tile=4096):
    """x: (B, 4) float32 (PyTorch layout). Returns (B, 1) float32."""
    B = x.shape[0]

    # Tiny batches: pad up to one 128-lane tile (negligible). Large batches are
    # streamed un-padded; Pallas masks the partial final block.
    if B < _LANE:
        x_in = jnp.pad(x, ((0, _LANE - B), (0, 0)))
        Bq = _LANE
    else:
        x_in = x
        Bq = B

    # Batch tile (lane axis): as big as b_tile, but always >= 2 grid steps when
    # the batch allows it, so the "parallel" axis can use both v7x TensorCores.
    n_blk = pl.cdiv(Bq, _LANE)
    t_blk = max(1, min(b_tile // _LANE, n_blk))
    if n_blk >= 2 and pl.cdiv(n_blk, t_blk) < 2:
        t_blk = pl.cdiv(n_blk, 2)
    bt = t_blk * _LANE
    grid = (pl.cdiv(Bq, bt),)

    w1 = params["w1"]                                   # (64, 4)
    b1 = params["b1"].reshape(64, 1)
    w2 = params["w2"]                                   # (64, 64)
    b2 = params["b2"].reshape(64, 1)
    w3 = jnp.pad(params["w3"], ((0, 7), (0, 0)))        # (1, 64) -> (8, 64)
    b3 = params["b3"].reshape(1, 1)

    def const_spec(a):  # weights/biases: VMEM-resident across all grid steps
        return pl.BlockSpec(a.shape, lambda i: (0, 0), memory_space=pltpu.VMEM)

    out = pl.pallas_call(
        _mlp_kernel,
        out_shape=jax.ShapeDtypeStruct((1, Bq), jnp.float32),
        grid=grid,
        in_specs=[
            pl.BlockSpec((bt, 4), lambda i: (i, 0), memory_space=pltpu.VMEM),
            const_spec(w1), const_spec(b1),
            const_spec(w2), const_spec(b2),
            const_spec(w3), const_spec(b3),
        ],
        out_specs=pl.BlockSpec((1, bt), lambda i: (0, i), memory_space=pltpu.VMEM),
        compiler_params=pltpu.CompilerParams(
            dimension_semantics=("parallel",),
            vmem_limit_bytes=32 * 1024 * 1024,
        ),
    )(x_in, w1, b1, w2, b2, w3, b3)

    return out[:, :B].reshape(B, 1)


def init_params(key):
    """Deterministic init matching PyTorch Linear shapes: w (out, in), b (out,)."""
    k1, k2, k3, k4, k5, k6 = jax.random.split(key, 6)

    def lin(kw, kb, fan_in, fan_out):
        bound = 1.0 / jnp.sqrt(fan_in)
        w = jax.random.uniform(kw, (fan_out, fan_in), jnp.float32, -bound, bound)
        b = jax.random.uniform(kb, (fan_out,), jnp.float32, -bound, bound)
        return w, b

    w1, b1 = lin(k1, k2, 4, 64)       # (64, 4),  (64,)
    w2, b2 = lin(k3, k4, 64, 64)      # (64, 64), (64,)
    w3, b3 = lin(k5, k6, 64, 1)       # (1, 64),  (1,)
    return dict(w1=w1, b1=b1, w2=w2, b2=b2, w3=w3, b3=b3)


def _reference(x, p):
    """Pure-JAX reference in the standard (B, features) layout."""
    hp = jax.lax.Precision.HIGHEST
    h1 = jnp.maximum(jnp.dot(x, p["w1"].T, precision=hp) + p["b1"], 0.0)
    h2 = jnp.maximum(jnp.dot(h1, p["w2"].T, precision=hp) + p["b2"], 0.0)
    return jnp.dot(h2, p["w3"].T, precision=hp) + p["b3"]


if __name__ == "__main__":
    key = jax.random.PRNGKey(0)
    kx, kp, kx2 = jax.random.split(key, 3)
    params = init_params(kp)

    # Small shape consistent with the module: batch=8, in_features=4.
    B = 8
    x = jax.random.normal(kx, (B, 4), jnp.float32)
    out = jax.block_until_ready(net_forward(x, params))
    ref = _reference(x, params)
    assert out.shape == (B, 1), out.shape
    assert jnp.allclose(out, ref, atol=1e-4, rtol=1e-4), "mismatch vs pure-JAX reference"

    # Multi-tile grid (>=2 steps for v7x megacore) + partial tail-block masking.
    B2 = 1000
    x2 = jax.random.normal(kx2, (B2, 4), jnp.float32)
    out2 = jax.block_until_ready(net_forward(x2, params))
    ref2 = _reference(x2, params)
    assert out2.shape == (B2, 1), out2.shape
    assert jnp.allclose(out2, ref2, atol=1e-4, rtol=1e-4), "mismatch on tiled path"

    print("KERNEL_OK")
</pallas_src>

<mosaic_0001>
module attributes {stable_mosaic.version = 11 : i64} {
  func.func @_mlp_kernel(%arg0: i32, %arg1: memref<128x4xf32, #tpu.memory_space<vmem>>, %arg2: memref<64x4xf32, #tpu.memory_space<vmem>>, %arg3: memref<64x1xf32, #tpu.memory_space<vmem>>, %arg4: memref<64x64xf32, #tpu.memory_space<vmem>>, %arg5: memref<64x1xf32, #tpu.memory_space<vmem>>, %arg6: memref<8x64xf32, #tpu.memory_space<vmem>>, %arg7: memref<1x1xf32, #tpu.memory_space<vmem>>, %arg8: memref<1x128xf32, #tpu.memory_space<vmem>>) attributes {dimension_semantics = [#tpu.dimension_semantics<parallel>], iteration_bounds = array<i64: 1>, scalar_prefetch = 0 : i64, scratch_operands = 0 : i64, tpu.core_type = #tpu.core_type<tc>, window_params = [{transform_indices = @transform_0, window_bounds = array<i64: 128, 4>}, {pipeline_mode = #tpu.pipeline_mode<synchronous>, transform_indices = @transform_1, window_bounds = array<i64: 64, 4>}, {pipeline_mode = #tpu.pipeline_mode<synchronous>, transform_indices = @transform_2, window_bounds = array<i64: 64, 1>}, {pipeline_mode = #tpu.pipeline_mode<synchronous>, transform_indices = @transform_3, window_bounds = array<i64: 64, 64>}, {pipeline_mode = #tpu.pipeline_mode<synchronous>, transform_indices = @transform_4, window_bounds = array<i64: 64, 1>}, {pipeline_mode = #tpu.pipeline_mode<synchronous>, transform_indices = @transform_5, window_bounds = array<i64: 8, 64>}, {pipeline_mode = #tpu.pipeline_mode<synchronous>, transform_indices = @transform_6, window_bounds = array<i64: 1, 1>}, {transform_indices = @transform_7, window_bounds = array<i64: 1, 128>}]} {
    %c0 = arith.constant 0 : index
    %c0_0 = arith.constant 0 : index
    %0 = vector.load %arg1[%c0, %c0_0] : memref<128x4xf32, #tpu.memory_space<vmem>>, vector<128x4xf32>
    %c0_1 = arith.constant 0 : index
    %c0_2 = arith.constant 0 : index
    %1 = vector.load %arg2[%c0_1, %c0_2] : memref<64x4xf32, #tpu.memory_space<vmem>>, vector<64x4xf32>
    %cst = arith.constant dense<0.000000e+00> : vector<64x128xf32>
    %2 = tpu.matmul %1, %0, %cst {dimension_numbers = #tpu.dot_dimension_numbers<[1], [1], [0], [0], [0, 0, 1, 0], [], []>} : vector<64x4xf32>, vector<128x4xf32>, vector<64x128xf32> -> vector<64x128xf32>
    %c0_3 = arith.constant 0 : index
    %c0_4 = arith.constant 0 : index
    %3 = vector.load %arg3[%c0_3, %c0_4] : memref<64x1xf32, #tpu.memory_space<vmem>>, vector<64x1xf32>
    %4 = vector.broadcast %3 : vector<64x1xf32> to vector<64x128xf32>
    %5 = arith.addf %2, %4 : vector<64x128xf32>
    %cst_5 = arith.constant 0.000000e+00 : f32
    %6 = vector.broadcast %cst_5 : f32 to vector<64x128xf32>
    %7 = arith.maximumf %5, %6 : vector<64x128xf32>
    %c0_6 = arith.constant 0 : index
    %c0_7 = arith.constant 0 : index
    %8 = vector.load %arg4[%c0_6, %c0_7] : memref<64x64xf32, #tpu.memory_space<vmem>>, vector<64x64xf32>
    %cst_8 = arith.constant dense<0.000000e+00> : vector<64x128xf32>
    %9 = tpu.matmul %8, %7, %cst_8 {dimension_numbers = #tpu.dot_dimension_numbers<[1], [0], [0], [1], [0, 0, 1, 1], [], []>} : vector<64x64xf32>, vector<64x128xf32>, vector<64x128xf32> -> vector<64x128xf32>
    %c0_9 = arith.constant 0 : index
    %c0_10 = arith.constant 0 : index
    %10 = vector.load %arg5[%c0_9, %c0_10] : memref<64x1xf32, #tpu.memory_space<vmem>>, vector<64x1xf32>
    %11 = vector.broadcast %10 : vector<64x1xf32> to vector<64x128xf32>
    %12 = arith.addf %9, %11 : vector<64x128xf32>
    %cst_11 = arith.constant 0.000000e+00 : f32
    %13 = vector.broadcast %cst_11 : f32 to vector<64x128xf32>
    %14 = arith.maximumf %12, %13 : vector<64x128xf32>
    %c0_12 = arith.constant 0 : index
    %c0_13 = arith.constant 0 : index
    %15 = vector.load %arg6[%c0_12, %c0_13] : memref<8x64xf32, #tpu.memory_space<vmem>>, vector<8x64xf32>
    %cst_14 = arith.constant dense<0.000000e+00> : vector<8x128xf32>
    %16 = tpu.matmul %15, %14, %cst_14 {dimension_numbers = #tpu.dot_dimension_numbers<[1], [0], [0], [1], [0, 0, 1, 1], [], []>} : vector<8x64xf32>, vector<64x128xf32>, vector<8x128xf32> -> vector<8x128xf32>
    %17 = vector.extract_strided_slice %16 {offsets = [0, 0], sizes = [1, 128], strides = [1, 1]} : vector<8x128xf32> to vector<1x128xf32>
    %c0_15 = arith.constant 0 : index
    %c0_16 = arith.constant 0 : index
    %18 = vector.load %arg7[%c0_15, %c0_16] : memref<1x1xf32, #tpu.memory_space<vmem>>, vector<1x1xf32>
    %19 = vector.broadcast %18 : vector<1x1xf32> to vector<1x128xf32>
    %20 = arith.addf %17, %19 : vector<1x128xf32>
    %c0_17 = arith.constant 0 : index
    %c0_18 = arith.constant 0 : index
    %21 = vector.load %arg8[%c0_17, %c0_18] : memref<1x128xf32, #tpu.memory_space<vmem>>, vector<1x128xf32>
    tpu.vector_store %arg8[%c0_17, %c0_18], %20 {strides = array<i32>} : memref<1x128xf32, #tpu.memory_space<vmem>>, vector<1x128xf32>,
    return
  }
  func.func @transform_0(%arg0: i32) -> (i32, i32) {
    %c0_i32 = arith.constant 0 : i32
    %c0_i32_0 = arith.constant 0 : i32
    return %arg0, %c0_i32 : i32, i32
  }
  func.func @transform_1(%arg0: i32) -> (i32, i32) {
    %c0_i32 = arith.constant 0 : i32
    %c0_i32_0 = arith.constant 0 : i32
    %c0_i32_1 = arith.constant 0 : i32
    return %c0_i32, %c0_i32_0 : i32, i32
  }
  func.func @transform_2(%arg0: i32) -> (i32, i32) {
    %c0_i32 = arith.constant 0 : i32
    %c0_i32_0 = arith.constant 0 : i32
    %c0_i32_1 = arith.constant 0 : i32
    return %c0_i32, %c0_i32_0 : i32, i32
  }
  func.func @transform_3(%arg0: i32) -> (i32, i32) {
    %c0_i32 = arith.constant 0 : i32
    %c0_i32_0 = arith.constant 0 : i32
    %c0_i32_1 = arith.constant 0 : i32
    return %c0_i32, %c0_i32_0 : i32, i32
  }
  func.func @transform_4(%arg0: i32) -> (i32, i32) {
    %c0_i32 = arith.constant 0 : i32
    %c0_i32_0 = arith.constant 0 : i32
    %c0_i32_1 = arith.constant 0 : i32
    return %c0_i32, %c0_i32_0 : i32, i32
  }
  func.func @transform_5(%arg0: i32) -> (i32, i32) {
    %c0_i32 = arith.constant 0 : i32
    %c0_i32_0 = arith.constant 0 : i32
    %c0_i32_1 = arith.constant 0 : i32
    return %c0_i32, %c0_i32_0 : i32, i32
  }
  func.func @transform_6(%arg0: i32) -> (i32, i32) {
    %c0_i32 = arith.constant 0 : i32
    %c0_i32_0 = arith.constant 0 : i32
    %c0_i32_1 = arith.constant 0 : i32
    return %c0_i32, %c0_i32_0 : i32, i32
  }
  func.func @transform_7(%arg0: i32) -> (i32, i32) {
    %c0_i32 = arith.constant 0 : i32
    %c0_i32_0 = arith.constant 0 : i32
    return %c0_i32, %arg0 : i32, i32
  }
}

</mosaic_0001>

<bundles_post_ra>
// kernel: tpu_custom_call.1
= control target key start
LH: loop header
LB: loop body
LE: loop exit
PB: predicated region body
PF: predicated region fallthrough
CT: control target
= control target key end

     0   :  { %s1028_s0 = inlined_call_operand.vmem [shape: f32[128,4], index: 0, kind: input, shape index: {}]   ;;  %s1029_s1 = inlined_call_operand.vmem [shape: f32[64,4], index: 1, kind: input, shape index: {}]   ;;  %s1030_s2 = inlined_call_operand.vmem [shape: f32[64,1], index: 2, kind: input, shape index: {}]   ;;  %s1031_s3 = inlined_call_operand.vmem [shape: f32[64,64], index: 3, kind: input, shape index: {}]   ;;  %s1032_s4 = inlined_call_operand.vmem [shape: f32[64,1], index: 4, kind: input, shape index: {}]   ;;  %s1033_s5 = inlined_call_operand.vmem [shape: f32[8,64], index: 5, kind: input, shape index: {}]   ;;  %s1034_s6 = inlined_call_operand.<no memory space> [shape: f32[1,1], index: 6, kind: input, shape index: {}]   ;;  %s1035_s7 = inlined_call_operand.hbm [shape: f32[1,128], index: 7, kind: output, shape index: {}]  }
   0x1   :  { %v12_v0 = vstv %s1034_s6 }
   0x2   :  { %13 = vst [vmem:[#allocation2] sm:$0x1] %v12_v0 }
   0x3   :  { %v44_v1 = vld [vmem:[%s1028_s0 + $0x78] sm:$0xff]  ;;  %vm101_vm0 = vcmask 31744   ;;  %v43_v2 = vld [vmem:[%s1028_s0 + $0x70] sm:$0xff]  ;;  %v782_v3 = vmov 0   ;;  %v42_v4 = vld [vmem:[%s1028_s0 + $0x68] sm:$0xff] }
   0x4   :  { %663 = vmatprep.subr.msk.mxu0 %vm101_vm0, %v44_v1  ;;  %758 = vset.pattern.permute.xlu0 %v782_v3  ;;  %v45_v5 = vld [vmem:[%s1029_s1] sm:$0xff]  ;;  %v60_v7 = vld [vmem:[%s1030_s2 + $0x38] sm:$0xff]  ;;  %v58_v8 = vld [vmem:[%s1030_s2 + $0x28] sm:$0xff] }
   0x5   :  { %664 = vmatpush3.xpose.msk.msra.mxu0 %vm101_vm0, %v44_v1  ;;  %759 = vset.pattern.permute.xlu1 %v782_v3  ;;  %v41_v6 = vld [vmem:[%s1028_s0 + $0x60] sm:$0xff]  ;;  %v59_v9 = vld [vmem:[%s1030_s2 + $0x30] sm:$0xff]  ;;  %v40_v11 = vld [vmem:[%s1028_s0 + $0x58] sm:$0xff] }
   0x6   :  { %665 = vmatprep.subr.msk.mxu0 %vm101_vm0, %v43_v2  ;;  %695 = vmatprep.mubr.msk.f32.mxu0 %vm101_vm0, %v45_v5  ;;  %v57_v10 = vld [vmem:[%s1030_s2 + $0x20] sm:$0xff] }
   0x7   :  { %98 = vperm.xlu0 %758, %v60_v7   ;;  %88 = vperm.xlu1 %759, %v58_v8  }
   0x9   :  { %666 = vmatpush3.xpose.msk.msra.mxu0 %vm101_vm0, %v43_v2 }
   0xa   :  { %667 = vmatprep.subr.msk.mxu0 %vm101_vm0, %v42_v4 }
   0xb   :  { %93 = vperm.xlu0 %758, %v59_v9   ;;  %83 = vperm.xlu1 %759, %v57_v10  }
   0xd   :  { %668 = vmatpush3.xpose.msk.msra.mxu0 %vm101_vm0, %v42_v4 }
   0xe   :  { %669 = vmatprep.subr.msk.mxu0 %vm101_vm0, %v41_v6 }
   0xf   :  { %14 = vsyncpa [#allocation4], 0  ;;  %v56_v12 = vld [vmem:[%s1030_s2 + $0x18] sm:$0xff]  ;;  %v55_v13 = vld [vmem:[%s1030_s2 + $0x10] sm:$0xff]  ;;  %vm343_vm1 = vcmask 523264   ;;  %vm784_vm2 = vmmov 0  }
  0x10   :  { %v39_v14 = vld [vmem:[%s1028_s0 + $0x50] sm:$0xff]  ;;  %78 = vperm.xlu0 %758, %v56_v12   ;;  %73 = vperm.xlu1 %759, %v55_v13   ;;  %v54_v15 = vld [vmem:[%s1030_s2 + $0x8] sm:$0xff]  ;;  %v53_v16 = vld [vmem:[%s1030_s2] sm:$0xff]  ;;  %s785_s20 = smov [#allocation3]  }
  0x11   :  { %670 = vmatpush3.xpose.msk.msra.mxu0 %vm101_vm0, %v41_v6  ;;  %v38_v17 = vld [vmem:[%s1028_s0 + $0x48] sm:$0xff]  ;;  %v302_v18 = vld [vmem:[%s1032_s4 + $0x38] sm:$0xff]  ;;  %v301_v19 = vld [vmem:[%s1032_s4 + $0x30] sm:$0xff]  ;;  %s573_s21 = sshll.u32 %s785_s20, 4  ;;  %s574_s21 = int_to_ptr.vmem [resolvable:$true] %s573_s21 }
  0x12   :  { %671 = vmatprep.subr.msk.mxu0 %vm101_vm0, %v40_v11  ;;  %v37_v20 = vld [vmem:[%s1028_s0 + $0x40] sm:$0xff]  ;;  %v300_v21 = vld [vmem:[%s1032_s4 + $0x28] sm:$0xff]  ;;  %v36_v23 = vld [vmem:[%s1028_s0 + $0x38] sm:$0xff]  ;;  %s764_s22 = scalar_lea.vmem %s574_s21, 32  ;;  %p765_p1 = scmp.lt.s32.totalorder %s574_s21, %s574_s21 }
  0x13   :  { %v299_v22 = vld [vmem:[%s1032_s4 + $0x20] sm:$0xff]  ;;  %v298_v24 = vld [vmem:[%s1032_s4 + $0x18] sm:$0xff]  ;;  %v297_v25 = vld [vmem:[%s1032_s4 + $0x10] sm:$0xff] }
  0x14   :  { %68 = vperm.xlu0 %758, %v54_v15   ;;  %63 = vperm.xlu1 %759, %v53_v16   ;;  %v35_v26 = vld [vmem:[%s1028_s0 + $0x30] sm:$0xff]  ;;  %v296_v27 = vld [vmem:[%s1032_s4 + $0x8] sm:$0xff]  ;;  %v295_v28 = vld [vmem:[%s1032_s4] sm:$0xff] }
  0x15   :  { %672 = vmatpush3.xpose.msk.msra.mxu0 %vm101_vm0, %v40_v11  ;;  %v34_v29 = vld [vmem:[%s1028_s0 + $0x28] sm:$0xff]  ;;  %v555_v30 = vld [vmem:[#allocation2] sm:$0x1]  ;;  %v32_v32 = vld [vmem:[%s1028_s0 + $0x18] sm:$0xff] }
  0x16   :  { %673 = vmatprep.subr.msk.mxu0 %vm101_vm0, %v39_v14  ;;  %v33_v31 = vld [vmem:[%s1028_s0 + $0x20] sm:$0xff]  ;;  %v31_v33 = vld [vmem:[%s1028_s0 + $0x10] sm:$0xff]  ;;  %v30_v34 = vld [vmem:[%s1028_s0 + $0x8] sm:$0xff] }
  0x17   :  { %v29_v35 = vld [vmem:[%s1028_s0] sm:$0xff]  ;;  %v46_v36 = vld [vmem:[%s1029_s1 + $0x8] sm:$0xff]  ;;  %v47_v37 = vld [vmem:[%s1029_s1 + $0x10] sm:$0xff]  ;;  %s760_s0 = scalar_lea.vmem %s574_s21, 16 }
  0x18   :  { %340 = vperm.xlu0 %758, %v302_v18   ;;  %335 = vperm.xlu1 %759, %v301_v19   ;;  %v48_v38 = vld [vmem:[%s1029_s1 + $0x18] sm:$0xff]  ;;  %v49_v39 = vld [vmem:[%s1029_s1 + $0x20] sm:$0xff]  ;;  %v50_v40 = vld [vmem:[%s1029_s1 + $0x28] sm:$0xff]  ;;  %v783_v19 = vmov 0.0   ;;  %p761_p0 = scmp.ne.s32.totalorder %s574_s21, %s760_s0  ;;  %p766_p2 = scmp.lt.s32.totalorder %s764_s22, %s760_s0 }
  0x19   :  { %674 = vmatpush3.xpose.msk.msra.mxu0 %vm101_vm0, %v39_v14  ;;  %v51_v41 = vld [vmem:[%s1029_s1 + $0x30] sm:$0xff]  ;;  %v52_v42 = vld [vmem:[%s1029_s1 + $0x38] sm:$0xff]  ;;  %v287_v43 = vld [vmem:[%s1031_s3] sm:$0xff] }
  0x1a   :  { %675 = vmatprep.subr.msk.mxu0 %vm101_vm0, %v38_v17  ;;  %723 = vmatprep.mubr.msk.f32.mxu1 %vm343_vm1, %v287_v43  ;;  %v288_v12 = vld [vmem:[%s1031_s3 + $0x8] sm:$0xff]  ;;  %v289_v13 = vld [vmem:[%s1031_s3 + $0x10] sm:$0xff]  ;;  %v290_v14 = vld [vmem:[%s1031_s3 + $0x18] sm:$0xff]  ;;  %p767_p3 = por %p766_p2, %p765_p1 }
  0x1b   :  { %v291_v15 = vld [vmem:[%s1031_s3 + $0x20] sm:$0xff]  ;;  %v292_v16 = vld [vmem:[%s1031_s3 + $0x28] sm:$0xff]  ;;  %v294_v18 = vld [vmem:[%s1031_s3 + $0x38] sm:$0xff] }
  0x1c   :  { %330 = vperm.xlu0 %758, %v300_v21   ;;  %325 = vperm.xlu1 %759, %v299_v22   ;;  %p768_p4 = pnand %p767_p3, %p761_p0 }
  0x1d   :  { %676 = vmatpush3.xpose.msk.msra.mxu0 %vm101_vm0, %v38_v17  ;;  %v293_v17 = vld [vmem:[%s1031_s3 + $0x30] sm:$0xff] }
  0x1e   :  { %677 = vmatprep.subr.msk.mxu0 %vm101_vm0, %v37_v20 }
  0x20   :  { %320 = vperm.xlu0 %758, %v298_v24   ;;  %315 = vperm.xlu1 %759, %v297_v25  }
  0x21   :  { %678 = vmatpush3.xpose.msk.msra.mxu0 %vm101_vm0, %v37_v20 }
  0x22   :  { %679 = vmatprep.subr.msk.mxu0 %vm101_vm0, %v36_v23 }
  0x24   :  { %310 = vperm.xlu0 %758, %v296_v27   ;;  %305 = vperm.xlu1 %759, %v295_v28  }
  0x25   :  { %680 = vmatpush3.xpose.msk.msra.mxu0 %vm101_vm0, %v36_v23 }
  0x26   :  { %681 = vmatprep.subr.msk.mxu0 %vm101_vm0, %v35_v26 }
  0x28   :  { %558 = vperm.xlu0 %758, %v555_v30  }
  0x29   :  { %682 = vmatpush3.xpose.msk.msra.mxu0 %vm101_vm0, %v35_v26 }
  0x2a   :  { %683 = vmatprep.subr.msk.mxu0 %vm101_vm0, %v34_v29 }
  0x2d   :  { %684 = vmatpush3.xpose.msk.msra.mxu0 %vm101_vm0, %v34_v29 }
  0x2e   :  { %685 = vmatprep.subr.msk.mxu0 %vm101_vm0, %v33_v31 }
  0x31   :  { %686 = vmatpush3.xpose.msk.msra.mxu0 %vm101_vm0, %v33_v31 }
  0x32   :  { %687 = vmatprep.subr.msk.mxu0 %vm101_vm0, %v32_v32 }
  0x35   :  { %688 = vmatpush3.xpose.msk.msra.mxu0 %vm101_vm0, %v32_v32 }
  0x36   :  { %689 = vmatprep.subr.msk.mxu0 %vm101_vm0, %v31_v33 }
  0x39   :  { %690 = vmatpush3.xpose.msk.msra.mxu0 %vm101_vm0, %v31_v33 }
  0x3a   :  { %691 = vmatprep.subr.msk.mxu0 %vm101_vm0, %v30_v34 }
  0x3d   :  { %692 = vmatpush3.xpose.msk.msra.mxu0 %vm101_vm0, %v30_v34 }
  0x3e   :  { %693 = vmatprep.subr.msk.mxu0 %vm101_vm0, %v29_v35 }
  0x41   :  { %694 = vmatpush3.xpose.msk.msra.mxu0 %vm101_vm0, %v29_v35 }
  0x44   :  { %696 = vmatmul.mubr.msk.f32.vlgmr.msra.gmra.mxu0 %vm101_vm0, %v46_v36 }
  0x45   :  { %698 = vmatprep.mubr.msk.f32.mxu0 %vm101_vm0, %v47_v37 }
  0x48   :  { %699 = vmatmul.mubr.msk.f32.gmra.mxu0 %vm101_vm0, %v48_v38 }
  0x49   :  { %701 = vmatprep.mubr.msk.f32.mxu0 %vm101_vm0, %v49_v39 }
  0x4c   :  { %702 = vmatmul.mubr.msk.f32.gmra.mxu0 %vm101_vm0, %v50_v40 }
  0x4d   :  { %704 = vmatprep.mubr.msk.f32.mxu0 %vm101_vm0, %v51_v41 }
  0x50   :  { %705 = vmatmul.mubr.msk.f32.gmra.mxu0 %vm101_vm0, %v52_v42 }
  0x82   :  { %v99_v46 = vpop.permute.xlu0 %98  ;;  %v89_v48 = vpop.permute.xlu1 %88 }
  0x86   :  { %v94_v51 = vpop.permute.xlu0 %93  ;;  %v84_v53 = vpop.permute.xlu1 %83 }
  0x8b   :  { %v79_v60 = vpop.permute.xlu0 %78  ;;  %v74_v63 = vpop.permute.xlu1 %73 }
  0x8f   :  { %v69_v4 = vpop.permute.xlu0 %68  ;;  %v64_v7 = vpop.permute.xlu1 %63 }
  0x93   :  { %v341_v22 = vpop.permute.xlu0 %340  ;;  %v336_v24 = vpop.permute.xlu1 %335 }
  0x97   :  { %v331_v27 = vpop.permute.xlu0 %330  ;;  %v326_v29 = vpop.permute.xlu1 %325 }
  0x9b   :  { %v321_v36 = vpop.permute.xlu0 %320  ;;  %v316_v39 = vpop.permute.xlu1 %315 }
 0x104   :  { %v697_v44 = vpop.f32.mrf.mxu0 }
 0x105   :  { %v246_v5 = vadd.f32 %v697_v44, %v69_v4  ;;  %v311_v44 = vpop.permute.xlu0 %310 }
 0x106   :  { %v240_v45 = vpop.f32.mrf.mxu0 }
 0x107   :  { %v241_v8 = vadd.f32 %v240_v45, %v64_v7  ;;  %v280_v10 = vmax.f32 %v246_v5, 0.0 }
 0x108   :  { %v700_v47 = vpop.f32.mrf.mxu0 }
 0x109   :  { %v256_v0 = vadd.f32 %v700_v47, %v79_v60  ;;  %v279_v11 = vmax.f32 %v241_v8, 0.0  ;;  %v306_v47 = vpop.permute.xlu1 %305 }
 0x10a   :  { %v250_v49 = vpop.f32.mrf.mxu0 }
 0x10b   :  { %v251_v2 = vadd.f32 %v250_v49, %v74_v63  ;;  %v282_v6 = vmax.f32 %v256_v0, 0.0 }
 0x10c   :  { %v703_v50 = vpop.f32.mrf.mxu0 }
 0x10d   :  { %v266_v57 = vadd.f32 %v703_v50, %v89_v48  ;;  %v281_v9 = vmax.f32 %v251_v2, 0.0 }
 0x10e   :  { %v260_v52 = vpop.f32.mrf.mxu0 }
 0x10f   :  { %v261_v61 = vadd.f32 %v260_v52, %v84_v53  ;;  %v284_v1 = vmax.f32 %v266_v57, 0.0  ;;  %v481_v52 = vld [vmem:[%s1033_s5] sm:$0xff]  ;;  %v561_v53 = vlaneseq }
 0x110   :  { %v706_v54 = vpop.f32.mrf.mxu0 }
 0x111   :  { %v276_v55 = vadd.f32 %v706_v54, %v99_v46  ;;  %v283_v3 = vmax.f32 %v261_v61, 0.0  ;;  %v562_v54 = vshrl.u32 %v561_v53, 7 }
 0x112   :  { %v270_v56 = vpop.f32.mrf.mxu0 }
 0x113   :  { %v286_v58 = vmax.f32 %v276_v55, 0.0  ;;  %v271_v59 = vadd.f32 %v270_v56, %v94_v51  ;;  %v563_v55 = vsub.s32 0, %v562_v54  ;;  %v559_v56 = vpop.permute.xlu0 %558 }
 0x115   :  { %v285_v62 = vmax.f32 %v271_v59, 0.0  ;;  %707 = vmatprep.subr.mxu1 %v286_v58  ;;  %v564_v57 = vrot.slane %v559_v56, %v563_v55 }
 0x116   :  { %708 = vmatpush3.msra.mxu1 %v286_v58 }
 0x117   :  { %709 = vmatprep.subr.mxu1 %v285_v62 }
 0x118   :  { %710 = vmatpush3.msra.mxu1 %v285_v62 }
 0x119   :  { %711 = vmatprep.subr.mxu1 %v284_v1 }
 0x11a   :  { %712 = vmatpush3.msra.mxu1 %v284_v1 }
 0x11b   :  { %713 = vmatprep.subr.mxu1 %v283_v3 }
 0x11c   :  { %714 = vmatpush3.msra.mxu1 %v283_v3 }
 0x11d   :  { %715 = vmatprep.subr.mxu1 %v282_v6 }
 0x11e   :  { %716 = vmatpush3.msra.mxu1 %v282_v6 }
 0x11f   :  { %717 = vmatprep.subr.mxu1 %v281_v9 }
 0x120   :  { %718 = vmatpush3.msra.mxu1 %v281_v9 }
 0x121   :  { %719 = vmatprep.subr.mxu1 %v280_v10 }
 0x122   :  { %720 = vmatpush3.msra.mxu1 %v280_v10 }
 0x123   :  { %721 = vmatprep.subr.mxu1 %v279_v11 }
 0x124   :  { %722 = vmatpush3.msra.mxu1 %v279_v11 }
 0x125   :  { %724 = vmatmul.mubr.msk.f32.vlgmr.msra.gmra.mxu1 %vm343_vm1, %v288_v12  ;;  %735 = vmatprep.subr.mxu1 %v783_v19 }
 0x126   :  { %726 = vmatprep.mubr.msk.f32.mxu1 %vm343_vm1, %v289_v13 }
 0x129   :  { %727 = vmatmul.mubr.msk.f32.gmra.mxu1 %vm343_vm1, %v290_v14 }
 0x12a   :  { %729 = vmatprep.mubr.msk.f32.mxu1 %vm343_vm1, %v291_v15 }
 0x12d   :  { %730 = vmatmul.mubr.msk.f32.gmra.mxu1 %vm343_vm1, %v292_v16 }
 0x12e   :  { %732 = vmatprep.mubr.msk.f32.mxu1 %vm343_vm1, %v293_v17 }
 0x131   :  { %733 = vmatmul.mubr.msk.f32.gmra.mxu1 %vm343_vm1, %v294_v18 }
 0x132   :  { %751 = vmatprep.mubr.msk.f32.mxu1 %vm784_vm2, %v783_v19 }
 0x1e5   :  { %v725_v20 = vpop.f32.mrf.mxu1 }
 0x1e6   :  { %v440_v45 = vadd.f32 %v725_v20, %v311_v44 }
 0x1e7   :  { %v434_v21 = vpop.f32.mrf.mxu1 }
 0x1e8   :  { %v435_v48 = vadd.f32 %v434_v21, %v306_v47  ;;  %v474_v50 = vmax.f32 %v440_v45, 0.0 }
 0x1e9   :  { %v728_v23 = vpop.f32.mrf.mxu1 }
 0x1ea   :  { %v450_v40 = vadd.f32 %v728_v23, %v321_v36  ;;  %v473_v51 = vmax.f32 %v435_v48, 0.0 }
 0x1eb   :  { %v444_v25 = vpop.f32.mrf.mxu1 }
 0x1ec   :  { %v445_v42 = vadd.f32 %v444_v25, %v316_v39  ;;  %v476_v46 = vmax.f32 %v450_v40, 0.0 }
 0x1ed   :  { %v731_v26 = vpop.f32.mrf.mxu1 }
 0x1ee   :  { %v460_v33 = vadd.f32 %v731_v26, %v331_v27  ;;  %v475_v49 = vmax.f32 %v445_v42, 0.0 }
 0x1ef   :  { %v454_v28 = vpop.f32.mrf.mxu1 }
 0x1f0   :  { %v455_v37 = vadd.f32 %v454_v28, %v326_v29  ;;  %v478_v41 = vmax.f32 %v460_v33, 0.0 }
 0x1f1   :  { %v734_v30 = vpop.f32.mrf.mxu1 }
 0x1f2   :  { %v470_v31 = vadd.f32 %v734_v30, %v341_v22  ;;  %v477_v43 = vmax.f32 %v455_v37, 0.0 }
 0x1f3   :  { %v464_v32 = vpop.f32.mrf.mxu1 }
 0x1f4   :  { %v480_v34 = vmax.f32 %v470_v31, 0.0  ;;  %v465_v35 = vadd.f32 %v464_v32, %v336_v24 }
 0x1f6   :  { %v479_v38 = vmax.f32 %v465_v35, 0.0  ;;  %736 = vmatpush3.msra.mxu1 %v480_v34 }
 0x1f7   :  { %737 = vmatprep.subr.mxu1 %v783_v19 }
 0x1f8   :  { %738 = vmatpush3.msra.mxu1 %v479_v38 }
 0x1f9   :  { %739 = vmatprep.subr.mxu1 %v783_v19 }
 0x1fa   :  { %740 = vmatpush3.msra.mxu1 %v478_v41 }
 0x1fb   :  { %741 = vmatprep.subr.mxu1 %v783_v19 }
 0x1fc   :  { %742 = vmatpush3.msra.mxu1 %v477_v43 }
 0x1fd   :  { %743 = vmatprep.subr.mxu1 %v783_v19 }
 0x1fe   :  { %744 = vmatpush3.msra.mxu1 %v476_v46 }
 0x1ff   :  { %745 = vmatprep.subr.mxu1 %v783_v19 }
 0x200   :  { %746 = vmatpush3.msra.mxu1 %v475_v49 }
 0x201   :  { %747 = vmatprep.subr.mxu1 %v783_v19 }
 0x202   :  { %748 = vmatpush3.msra.mxu1 %v474_v50 }
 0x203   :  { %749 = vmatprep.subr.mxu1 %v783_v19 }
 0x204   :  { %750 = vmatpush3.msra.mxu1 %v473_v51 }
 0x205   :  { %752 = vmatmul.mubr.msk.f32.vlgmr.msra.gmra.mxu1 %vm343_vm1, %v481_v52 }
 0x2c5   :  { %v551_v58 = vpop.f32.mrf.mxu1 }
 0x2c6   :  { %v565_v59 = vadd.f32 %v564_v57, %v551_v58 }
 0x2c7   :  { %v753_v60 = vpop.f32.mrf.mxu1 }
 0x2c8   :  { %566 = vst [vmem:[#allocation3] sm:$0x1] %v565_v59 }
 0x2c9   :  { %771 = shalt.err (!%p768_p4)
}
 0x2ca   :  { %576 = dma.vmem_to_hbm [thread:$0]  %s574_s21, 16, %s1035_s7, [#allocation4]  }
 0x2cb   :  { %780 = dma.done.wait [#allocation4], 16  }
 0x2cc   :  { %781 = vsyncadd [#allocation4], 4294967280 }
 0x2cd   :  { %580 = vsyncpa [#allocation4], 1 }

</bundles_post_ra>
